<compile_context>
chip_gen: v5e
topology: v5e:2x2
jax: 0.10.0
libtpu: 0.0.40
codegen_flags: <defaults>
</compile_context>

<pallas_src>
import functools

import jax
import jax.numpy as jnp
from jax.experimental import pallas as pl
from jax.experimental.pallas import tpu as pltpu

_LANES = 128


def _binary_dice_kernel(p_ref, t_ref, num_ref, den_ref, *,
                        tm, lanes, rows_total, chunks_per_split,
                        need_row_mask):
    """Process one (tm, lanes) tile of one sample.

    p_ref / t_ref : (tm, lanes) input tiles (any dtype, upcast to f32 here).
    num_ref/den_ref: resident (8, lanes) f32 output blocks, used directly as
                     accumulators (same block index across the reduction axis).
    """
    s = pl.program_id(0)          # row-split index            ("parallel")
    r = pl.program_id(2)          # row-chunk within the split ("arbitrary")

    @pl.when(r == 0)
    def _init():
        num_ref[...] = jnp.zeros_like(num_ref)
        den_ref[...] = jnp.zeros_like(den_ref)

    logits = p_ref[...].astype(jnp.float32)
    t_raw = t_ref[...].astype(jnp.float32)

    # sigmoid(x) = 0.5 * tanh(0.5 * x) + 0.5  -> one EUP op (vs exp + recip).
    predict = 0.5 * jnp.tanh(0.5 * logits) + 0.5
    # target_[target == -1] = 0
    target = jnp.where(t_raw == -1.0, 0.0, t_raw)

    num_t = predict * target
    den_t = predict + target

    def _accumulate(n, d):
        # Sublane-aligned tree reduce: (tm,128) -> (tm//8, 8, 128) -> (8,128).
        # Pure vreg-wise VALU adds; exactly one load + one store per
        # accumulator per grid step (no (tm,128) scratch traffic).
        num_ref[...] += jnp.sum(n.reshape(tm // 8, 8, lanes), axis=0)
        den_ref[...] += jnp.sum(d.reshape(tm // 8, 8, lanes), axis=0)

    if need_row_mask:
        # Only the globally-last row chunk can contain out-of-range rows.
        last = jnp.logical_and(s == pl.num_programs(0) - 1,
                               r == pl.num_programs(2) - 1)

        @pl.when(jnp.logical_not(last))
        def _full_chunk():
            _accumulate(num_t, den_t)

        @pl.when(last)
        def _masked_tail_chunk():
            base = (s * chunks_per_split + r) * tm
            row = jax.lax.broadcasted_iota(jnp.int32, (tm, lanes), 0) + base
            valid = row < rows_total
            _accumulate(jnp.where(valid, num_t, 0.0),
                        jnp.where(valid, den_t, 0.0))
    else:
        _accumulate(num_t, den_t)


def _binary_dice_jax(p2, t2, smooth):
    """Pure-JAX path (fallback + reference math)."""
    p = jax.nn.sigmoid(p2.astype(jnp.float32))
    t = t2.astype(jnp.float32)
    t = jnp.where(t == -1.0, 0.0, t)
    num = jnp.sum(p * t, axis=1)
    den = jnp.sum(p, axis=1) + jnp.sum(t, axis=1) + smooth
    dice = 2.0 * num / den
    return jnp.sum(dice) / dice.shape[0]


def binary_dice(predict, target, smooth=1.0, tm_max=4096,
                small_fallback_bytes=2 << 20):
    """predict, target: (B, ...) arrays (e.g. NCHW). Returns scalar f32 mean dice."""
    assert predict.shape[0] == target.shape[0], (
        "predict & target batch size don't match")
    B = predict.shape[0]
    p2 = predict.reshape(B, -1)
    t2 = target.reshape(B, -1)
    assert p2.shape == t2.shape
    N = p2.shape[1]
    L = _LANES
    rows = N // L

    in_bytes = B * N * (p2.dtype.itemsize + t2.dtype.itemsize)

    # Sublane packing of the narrowest input dtype (8 rows/vreg for 32-bit,
    # 16 for bf16/f16, 32 for 8-bit).  Inputs stay in their native dtype
    # (bf16 halves HBM traffic); the kernel upcasts per tile.
    min_itemsize = min(p2.dtype.itemsize, t2.dtype.itemsize)
    sub = {4: 8, 2: 16, 1: 32}.get(min_itemsize, 8)

    # Pure-JAX fallback: ragged N (would need a full pad/slice HBM copy),
    # too few 128-lane rows, or a launch-overhead-dominated tiny problem.
    if (N % L != 0) or (rows < 8) or (in_bytes <= small_fallback_bytes):
        return _binary_dice_jax(p2, t2, smooth)

    p3 = p2.reshape(B, rows, L)      # metadata-only reshape (N % 128 == 0)
    t3 = t2.reshape(B, rows, L)

    # Row-chunk size: multiple of 8 (for the (tm//8, 8, 128) tree reduce) and
    # of the dtype sublane packing whenever it does not span the full extent.
    tm_max = max(sub, (int(tm_max) // sub) * sub)
    if rows <= tm_max and rows % 8 == 0:
        tm = rows                      # single chunk, full-extent block
    else:
        tm = min(tm_max, (rows // sub) * sub)
    if tm < 8:
        return _binary_dice_jax(p2, t2, smooth)

    chunks = pl.cdiv(rows, tm)
    need_row_mask = (rows % tm) != 0

    # Row split so both v7x TensorCores get work when B == 1.  Only enabled
    # when it divides evenly, so no out-of-range block indices are generated.
    splits = 2 if (B == 1 and chunks >= 2 and chunks % 2 == 0) else 1
    cps = chunks // splits

    kernel = functools.partial(
        _binary_dice_kernel, tm=tm, lanes=L, rows_total=rows,
        chunks_per_split=cps, need_row_mask=need_row_mask)

    out_bytes = 2 * splits * B * 8 * L * 4
    cost = pl.CostEstimate(flops=7 * B * N,
                           transcendentals=B * N,
                           bytes_accessed=in_bytes + out_bytes)

    # Double-buffered input blocks dominate VMEM; outputs are tiny (8,128) f32.
    block_bytes = tm * L * (p3.dtype.itemsize + t3.dtype.itemsize)
    vmem_limit = int(min(48 << 20, max(16 << 20, 2 * block_bytes + (4 << 20))))

    num_out, den_out = pl.pallas_call(
        kernel,
        out_shape=(jax.ShapeDtypeStruct((splits * B, 8, L), jnp.float32),
                   jax.ShapeDtypeStruct((splits * B, 8, L), jnp.float32)),
        grid_spec=pltpu.PrefetchScalarGridSpec(
            num_scalar_prefetch=0,
            grid=(splits, B, cps),
            in_specs=[
                pl.BlockSpec((None, tm, L), lambda s, b, r: (b, s * cps + r, 0)),
                pl.BlockSpec((None, tm, L), lambda s, b, r: (b, s * cps + r, 0)),
            ],
            out_specs=[
                pl.BlockSpec((None, 8, L), lambda s, b, r: (s * B + b, 0, 0)),
                pl.BlockSpec((None, 8, L), lambda s, b, r: (s * B + b, 0, 0)),
            ],
        ),
        compiler_params=pltpu.CompilerParams(
            dimension_semantics=("parallel", "parallel", "arbitrary"),
            vmem_limit_bytes=vmem_limit),
        cost_estimate=cost,
    )(p3, t3)

    # Tiny JAX epilogue: cross-lane reduce, combine row-splits, dice + mean.
    num = jnp.sum(num_out, axis=(1, 2)).reshape(splits, B).sum(axis=0)   # (B,)
    den = jnp.sum(den_out, axis=(1, 2)).reshape(splits, B).sum(axis=0)   # (B,)
    dice = 2.0 * num / (den + smooth)
    return jnp.sum(dice) / B


def binary_dice_ref(predict, target, smooth=1.0):
    """Pure-JAX reference mirroring the PyTorch forward."""
    B = predict.shape[0]
    return _binary_dice_jax(predict.reshape(B, -1), target.reshape(B, -1), smooth)


if __name__ == "__main__":
    key = jax.random.PRNGKey(0)
    keys = jax.random.split(key, 10)

    def make_case(kp, kt, shape, p_dtype=jnp.float32):
        p = jax.random.normal(kp, shape, dtype=jnp.float32).astype(p_dtype)
        # targets in {-1, 0, 1} to exercise the "-1 -> 0" remap
        t = jax.random.randint(kt, shape, -1, 2).astype(jnp.float32)
        return p, t

    def check(name, p, t, **kw):
        out = jax.block_until_ready(binary_dice(p, t, smooth=1.0, **kw))
        ref = jax.block_until_ready(binary_dice_ref(p, t, smooth=1.0))
        assert jnp.allclose(out, ref, rtol=1e-4, atol=1e-4), (name, out, ref)

    # 1) Module's natural small shape (B=2, C=4, 16x16 -> N=1024, rows=8),
    #    forced through the Pallas path: single chunk, tm=8.
    p, t = make_case(keys[0], keys[1], (2, 4, 16, 16))
    check("small", p, t, small_fallback_bytes=0)

    # 2) Multi-chunk with a partial last chunk (rows=100, tm=96, mask path)
    #    and a bf16 `predict` (kernel upcasts per tile).
    p, t = make_case(keys[2], keys[3], (2, 8, 40, 40), p_dtype=jnp.bfloat16)
    check("multichunk_bf16", p, t, small_fallback_bytes=0)

    # 3) B == 1 row-split: rows=128, tm=32 -> 4 chunks split across 2 parallel
    #    segments (both v7x TensorCores busy; no-op on v5e/v6e).
    p, t = make_case(keys[4], keys[5], (1, 4, 64, 64))
    check("rowsplit_b1", p, t, tm_max=32, small_fallback_bytes=0)

    # 4) Ragged N (3*10*10 = 300, not a multiple of 128) -> pure-JAX fallback.
    p, t = make_case(keys[6], keys[7], (2, 3, 10, 10))
    check("ragged_fallback", p, t)

    # 5) Default configuration above the small-problem threshold
    #    (N=204800, rows=1600, single chunk) -> production Pallas path.
    p, t = make_case(keys[8], keys[9], (2, 8, 160, 160))
    check("default_path", p, t)

    print("KERNEL_OK")
</pallas_src>

<mosaic_0001>
module attributes {stable_mosaic.version = 11 : i64} {
  func.func @_binary_dice_kernel(%arg0: i32, %arg1: i32, %arg2: i32, %arg3: memref<1x8x128xf32, #tpu.memory_space<vmem>>, %arg4: memref<1x8x128xf32, #tpu.memory_space<vmem>>, %arg5: memref<1x8x128xf32, #tpu.memory_space<vmem>>, %arg6: memref<1x8x128xf32, #tpu.memory_space<vmem>>) attributes {dimension_semantics = [#tpu.dimension_semantics<parallel>, #tpu.dimension_semantics<parallel>, #tpu.dimension_semantics<arbitrary>], iteration_bounds = array<i64: 1, 2, 1>, scalar_prefetch = 0 : i64, scratch_operands = 0 : i64, tpu.core_type = #tpu.core_type<tc>, window_params = [{transform_indices = @transform_0, window_bounds = array<i64: 1, 8, 128>}, {transform_indices = @transform_1, window_bounds = array<i64: 1, 8, 128>}, {transform_indices = @transform_2, window_bounds = array<i64: 1, 8, 128>}, {transform_indices = @transform_3, window_bounds = array<i64: 1, 8, 128>}]} {
    %c0_i32 = arith.constant 0 : i32
    %0 = arith.cmpi eq, %arg2, %c0_i32 : i32
    %1 = arith.extui %0 : i1 to i32
    %c0_i32_0 = arith.constant 0 : i32
    %2 = arith.cmpi ne, %1, %c0_i32_0 : i32
    scf.if %2 {
      %cst_24 = arith.constant 0.000000e+00 : f32
      %36 = vector.broadcast %cst_24 : f32 to vector<8x128xf32>
      %c0_25 = arith.constant 0 : index
      %c0_26 = arith.constant 0 : index
      %c0_27 = arith.constant 0 : index
      %37 = vector.load %arg5[%c0_25, %c0_26, %c0_27] : memref<1x8x128xf32, #tpu.memory_space<vmem>>, vector<1x8x128xf32>
      %38 = vector.shape_cast %37 : vector<1x8x128xf32> to vector<8x128xf32>
      %39 = vector.shape_cast %36 : vector<8x128xf32> to vector<1x8x128xf32>
      tpu.vector_store %arg5[%c0_25, %c0_26, %c0_27], %39 {strides = array<i32>} : memref<1x8x128xf32, #tpu.memory_space<vmem>>, vector<1x8x128xf32>,
      %cst_28 = arith.constant 0.000000e+00 : f32
      %40 = vector.broadcast %cst_28 : f32 to vector<8x128xf32>
      %c0_29 = arith.constant 0 : index
      %c0_30 = arith.constant 0 : index
      %c0_31 = arith.constant 0 : index
      %41 = vector.load %arg6[%c0_29, %c0_30, %c0_31] : memref<1x8x128xf32, #tpu.memory_space<vmem>>, vector<1x8x128xf32>
      %42 = vector.shape_cast %41 : vector<1x8x128xf32> to vector<8x128xf32>
      %43 = vector.shape_cast %40 : vector<8x128xf32> to vector<1x8x128xf32>
      tpu.vector_store %arg6[%c0_29, %c0_30, %c0_31], %43 {strides = array<i32>} : memref<1x8x128xf32, #tpu.memory_space<vmem>>, vector<1x8x128xf32>,
    } else {
    }
    %c0 = arith.constant 0 : index
    %c0_1 = arith.constant 0 : index
    %c0_2 = arith.constant 0 : index
    %3 = vector.load %arg3[%c0, %c0_1, %c0_2] : memref<1x8x128xf32, #tpu.memory_space<vmem>>, vector<1x8x128xf32>
    %4 = vector.shape_cast %3 : vector<1x8x128xf32> to vector<8x128xf32>
    %c0_3 = arith.constant 0 : index
    %c0_4 = arith.constant 0 : index
    %c0_5 = arith.constant 0 : index
    %5 = vector.load %arg4[%c0_3, %c0_4, %c0_5] : memref<1x8x128xf32, #tpu.memory_space<vmem>>, vector<1x8x128xf32>
    %6 = vector.shape_cast %5 : vector<1x8x128xf32> to vector<8x128xf32>
    %cst = arith.constant 5.000000e-01 : f32
    %7 = vector.broadcast %cst : f32 to vector<8x128xf32>
    %8 = arith.mulf %7, %4 : vector<8x128xf32>
    %9 = math.tanh %8 : vector<8x128xf32>
    %cst_6 = arith.constant 5.000000e-01 : f32
    %10 = vector.broadcast %cst_6 : f32 to vector<8x128xf32>
    %11 = arith.mulf %10, %9 : vector<8x128xf32>
    %cst_7 = arith.constant 5.000000e-01 : f32
    %12 = vector.broadcast %cst_7 : f32 to vector<8x128xf32>
    %13 = arith.addf %11, %12 : vector<8x128xf32>
    %cst_8 = arith.constant -1.000000e+00 : f32
    %14 = vector.broadcast %cst_8 : f32 to vector<8x128xf32>
    %15 = arith.cmpf oeq, %6, %14 : vector<8x128xf32>
    %cst_9 = arith.constant 0.000000e+00 : f32
    %16 = vector.broadcast %cst_9 : f32 to vector<8x128xf32>
    %17 = arith.select %15, %16, %6 : vector<8x128xi1>, vector<8x128xf32>
    %18 = arith.mulf %13, %17 : vector<8x128xf32>
    %19 = arith.addf %13, %17 : vector<8x128xf32>
    %c0_10 = arith.constant 0 : index
    %c0_11 = arith.constant 0 : index
    %c0_12 = arith.constant 0 : index
    %20 = vector.load %arg5[%c0_10, %c0_11, %c0_12] : memref<1x8x128xf32, #tpu.memory_space<vmem>>, vector<1x8x128xf32>
    %21 = vector.shape_cast %20 : vector<1x8x128xf32> to vector<8x128xf32>
    %22 = vector.shape_cast %18 : vector<8x128xf32> to vector<1x8x128xf32>
    %cst_13 = arith.constant dense<0.000000e+00> : vector<8x128xf32>
    %23 = vector.multi_reduction <add>, %22, %cst_13 [0] : vector<1x8x128xf32> to vector<8x128xf32>
    %24 = arith.addf %21, %23 : vector<8x128xf32>
    %c0_14 = arith.constant 0 : index
    %c0_15 = arith.constant 0 : index
    %c0_16 = arith.constant 0 : index
    %25 = vector.load %arg5[%c0_14, %c0_15, %c0_16] : memref<1x8x128xf32, #tpu.memory_space<vmem>>, vector<1x8x128xf32>
    %26 = vector.shape_cast %25 : vector<1x8x128xf32> to vector<8x128xf32>
    %27 = vector.shape_cast %24 : vector<8x128xf32> to vector<1x8x128xf32>
    tpu.vector_store %arg5[%c0_14, %c0_15, %c0_16], %27 {strides = array<i32>} : memref<1x8x128xf32, #tpu.memory_space<vmem>>, vector<1x8x128xf32>,
    %c0_17 = arith.constant 0 : index
    %c0_18 = arith.constant 0 : index
    %c0_19 = arith.constant 0 : index
    %28 = vector.load %arg6[%c0_17, %c0_18, %c0_19] : memref<1x8x128xf32, #tpu.memory_space<vmem>>, vector<1x8x128xf32>
    %29 = vector.shape_cast %28 : vector<1x8x128xf32> to vector<8x128xf32>
    %30 = vector.shape_cast %19 : vector<8x128xf32> to vector<1x8x128xf32>
    %cst_20 = arith.constant dense<0.000000e+00> : vector<8x128xf32>
    %31 = vector.multi_reduction <add>, %30, %cst_20 [0] : vector<1x8x128xf32> to vector<8x128xf32>
    %32 = arith.addf %29, %31 : vector<8x128xf32>
    %c0_21 = arith.constant 0 : index
    %c0_22 = arith.constant 0 : index
    %c0_23 = arith.constant 0 : index
    %33 = vector.load %arg6[%c0_21, %c0_22, %c0_23] : memref<1x8x128xf32, #tpu.memory_space<vmem>>, vector<1x8x128xf32>
    %34 = vector.shape_cast %33 : vector<1x8x128xf32> to vector<8x128xf32>
    %35 = vector.shape_cast %32 : vector<8x128xf32> to vector<1x8x128xf32>
    tpu.vector_store %arg6[%c0_21, %c0_22, %c0_23], %35 {strides = array<i32>} : memref<1x8x128xf32, #tpu.memory_space<vmem>>, vector<1x8x128xf32>,
    return
  }
  func.func @transform_0(%arg0: i32, %arg1: i32, %arg2: i32) -> (i32, i32, i32) {
    %c1_i32 = arith.constant 1 : i32
    %0 = arith.muli %arg0, %c1_i32 : i32
    %1 = arith.addi %0, %arg2 : i32
    %c0_i32 = arith.constant 0 : i32
    %c0_i32_0 = arith.constant 0 : i32
    return %arg1, %1, %c0_i32 : i32, i32, i32
  }
  func.func @transform_1(%arg0: i32, %arg1: i32, %arg2: i32) -> (i32, i32, i32) {
    %c1_i32 = arith.constant 1 : i32
    %0 = arith.muli %arg0, %c1_i32 : i32
    %1 = arith.addi %0, %arg2 : i32
    %c0_i32 = arith.constant 0 : i32
    %c0_i32_0 = arith.constant 0 : i32
    return %arg1, %1, %c0_i32 : i32, i32, i32
  }
  func.func @transform_2(%arg0: i32, %arg1: i32, %arg2: i32) -> (i32, i32, i32) {
    %c2_i32 = arith.constant 2 : i32
    %0 = arith.muli %arg0, %c2_i32 : i32
    %1 = arith.addi %0, %arg1 : i32
    %c0_i32 = arith.constant 0 : i32
    %c0_i32_0 = arith.constant 0 : i32
    %c0_i32_1 = arith.constant 0 : i32
    return %1, %c0_i32, %c0_i32_0 : i32, i32, i32
  }
  func.func @transform_3(%arg0: i32, %arg1: i32, %arg2: i32) -> (i32, i32, i32) {
    %c2_i32 = arith.constant 2 : i32
    %0 = arith.muli %arg0, %c2_i32 : i32
    %1 = arith.addi %0, %arg1 : i32
    %c0_i32 = arith.constant 0 : i32
    %c0_i32_0 = arith.constant 0 : i32
    %c0_i32_1 = arith.constant 0 : i32
    return %1, %c0_i32, %c0_i32_0 : i32, i32, i32
  }
}

</mosaic_0001>

<bundles_post_ra>
// kernel: tpu_custom_call.1
= control target key start
LH: loop header
LB: loop body
LE: loop exit
PB: predicated region body
PF: predicated region fallthrough
CT: control target
= control target key end

     0   :  { %9 = vsyncpa [#allocation3], 0  ;;  %s942_s0 = inlined_call_operand.hbm [shape: f32[2,8,128], index: 0, kind: input, shape index: {}]   ;;  %s943_s1 = inlined_call_operand.hbm [shape: f32[2,8,128], index: 1, kind: input, shape index: {}]   ;;  %s944_s2 = inlined_call_operand.hbm [shape: f32[2,8,128], index: 2, kind: output, shape index: {0}]   ;;  %s945_s3 = inlined_call_operand.hbm [shape: f32[2,8,128], index: 3, kind: output, shape index: {1}]  }
   0x1   :  { %11 = vsyncpa [#allocation3 + $0x1], 0 }
   0x2   :  { %12 = vsyncpa [#allocation6], 0 }
   0x3   :  { %14 = vsyncpa [#allocation6 + $0x1], 0 }
   0x4   :  { %15 = vsyncpa [#allocation4], 0 }
   0x5   :  { %17 = vsyncpa [#allocation4 + $0x1], 0 }
   0x6   :  { %18 = vsyncpa [#allocation9], 0 }
   0x7   :  { %20 = vsyncpa [#allocation9 + $0x1], 0  ;;  %s785_s12 = smov 0   ;;  %s787_s13 = smov 0  }
   0x8   :  { %s789_s14 = smov 0   ;;  %s791_s15 = smov 0  }
   0x9   :  { %s793_s16 = smov 0   ;;  %s795_s17 = smov 0  }
   0xa LB: > { %s491_s18 = sadd.s32 4294967295, %s763_s17   ;;  %s492_s19 = sadd.s32 4294967294, %s763_s17   ;;  %s763_s17 = sphi %s795_s17, %s26_s17   ;;  %s759_s16 = sphi %s793_s16, %s954_s16   ;;  %s755_s15 = sphi %s791_s15, %s953_s15   ;;  %s751_s14 = sphi %s789_s14, %s952_s14   ;;  %s747_s13 = sphi %s787_s13, %s951_s13   ;;  %s743_s12 = sphi %s785_s12, %s950_s12  }
   0xb   : > { %s41_s20 = sadd.s32 1, %s759_s16  ;;  %s56_s21 = sadd.s32 1, %s751_s14 }
   0xc   : > { %p43_p0 = scmp.ge.s32.totalorder %s41_s20, 2  ;;  %p63_p1 = scmp.ne.s32.totalorder %s751_s14, %s747_s13 }
   0xd   : > { %p64_p2 = scmp.eq.s32.totalorder %s763_s17, 0  ;;  %p69_p3 = scmp.ne.s32.totalorder %s747_s13, %s743_s12 }
   0xe   : > { %s956_s20 = smov (%p43_p0, %s41_s20), 0  ;;  %p70_p5 = scmp.eq.s32.totalorder %s491_s18, 0 }
   0xf   : > { %p826_p4 = por %p64_p2, %p63_p1  ;;  %s51_s23 = ssub.s32 %s759_s16, %s956_s20 }
  0x10   : > { %p127_p6 = scmp.eq.s32.totalorder %s491_s18, 1  ;;  %p54_p7 = scmp.eq.s32.totalorder %s51_s23, 0 }
  0x11   : > { %p832_p8 = por %p70_p5, %p69_p3  ;;  %p133_p10 = scmp.eq.s32.totalorder %s492_s19, 1 }
  0x12   : > { %p836_p9 = por %p127_p6, %p63_p1  ;;  %p494_p12 = scmp.ge.s32.totalorder %s763_s17, 2 }
  0x13   : > { %s841_s26 = scalar_select %p54_p7, %s751_s14, %s56_s21  }
  0x14   : > { %p843_p11 = por %p133_p10, %p69_p3  ;;  %p532_p13 = scmp.lt.s32.totalorder %s763_s17, 2 }
  0x15   : > { %s183_s28 = sand.u32 1, %s751_s14   ;;  %s496_s30 = sshll.u32 %s759_s16, 3 }
  0x16   : > { %s495_s29 = sshll.u32 %s183_s28, 3  ;;  %s193_s6 = scalar_lea.hbm %s942_s0, %s496_s30 }
  0x17   : > { %s187_s7 = scalar_lea.vmem [#allocation2], %s495_s29  ;;  %s195_s9 = sshll.u32 %s193_s6, 4  ;;  %s196_s9 = int_to_ptr.hbm [resolvable:$true] %s195_s9 }
  0x18   : > { %s197_s8 = sshll.u32 %s187_s7, 4  ;;  %p519_p0 = pnand %p532_p13, %p826_p4  ;;  %s198_s8 = int_to_ptr.vmem [resolvable:$true] %s197_s8 }
  0x19   : > { %p499_p1 = scmp.ge.s32.totalorder %s763_s17, 1  ;;  %p223_p2 = scmp.lt.s32.totalorder %s763_s17, 3 }
  0x1a   : > { %s184_s10 = scalar_lea.sflag [#allocation3], %s183_s28  ;;  %s214_s19 = scalar_lea.hbm %s943_s1, %s496_s30 }
  0x1b   : > { %521 = dma.hbm_to_vmem [thread:$0]  (!%p519_p0), %s196_s9, 128, %s198_s8, %s184_s10  }
  0x1c   : > { %p224_p3 = pnand %p499_p1, %p223_p2  ;;  %s208_s21 = scalar_lea.vmem [#allocation5], %s495_s29 }
  0x1d   : > { %s218_s23 = sshll.u32 %s208_s21, 4  ;;  %s216_s4 = sshll.u32 %s214_s19, 4  ;;  %s219_s23 = int_to_ptr.vmem [resolvable:$true] %s218_s23  ;;  %s217_s4 = int_to_ptr.hbm [resolvable:$true] %s216_s4 }
  0x1e   : > { %s205_s5 = scalar_lea.sflag [#allocation6], %s183_s28  ;;  %227 = sbr.rel (%p224_p3) target bundleno = 70 (0x46), region = 28 }
  0x1f   : > { %524 = dma.hbm_to_vmem [thread:$0]  (!%p519_p0), %s217_s4, 128, %s219_s23, %s205_s5  }
  0x20   : > { %s862_s22 = sand.u32 (!%p224_p3), 1, %s747_s13  }
  0x21   : > { %s865_s6 = sshll.u32 (!%p224_p3), %s862_s22, 3  ;;  %s230_s7 = scalar_lea.sflag (!%p224_p3), [#allocation3], %s862_s22 }
  0x22   : > { %s233_s8 = scalar_lea.vmem (!%p224_p3), [#allocation2], %s865_s6 }
  0x23   : > { %726 = dma.done.wait (%p832_p8), %s230_s7, 128  }
  0x24   : > { %728 = vsyncadd (%p832_p8), %s230_s7, 4294967168  ;;  %s240_s28 = scalar_lea.sflag [#allocation6], %s862_s22  ;;  %s243_s29 = scalar_lea.vmem [#allocation5], %s865_s6 }
  0x25   : > { %730 = dma.done.wait (%p832_p8), %s240_s28, 128  }
  0x26   : > { %732 = vsyncadd (%p832_p8), %s240_s28, 4294967168  ;;  %v289_v0 = vld [vmem:[%s233_s8] sm:$0xff]  ;;  %v290_v2 = vld [vmem:[%s243_s29] sm:$0xff]  ;;  %s506_s30 = sshll.u32 %s755_s15, 3  ;;  %s269_s21 = scalar_lea.vmem [#allocation7], %s865_s6 }
  0x27   : > { %v291_v1 = vmul.f32 0.5, %v289_v0  ;;  %vm295_vm0 = vcmp.eq.f32.partialorder %v290_v2, -1.0  ;;  %s325_s11 = scalar_lea.hbm %s944_s2, %s506_s30  ;;  %s341_s24 = scalar_lea.hbm %s945_s3, %s506_s30 }
  0x28   : > { %v296_v5 = vsel %vm295_vm0, 0.0, %v290_v2  ;;  %s327_s23 = sshll.u32 %s269_s21, 4  ;;  %s329_s4 = sshll.u32 %s325_s11, 4  ;;  %s328_s23 = int_to_ptr.vmem [resolvable:$true] %s327_s23  ;;  %s330_s4 = int_to_ptr.hbm [resolvable:$true] %s329_s4 }
  0x29   : > { %583 = vtanh.f32 %v291_v1  ;;  %s276_s15 = scalar_lea.vmem [#allocation8], %s865_s6  ;;  %s345_s7 = sshll.u32 %s341_s24, 4  ;;  %s891_s7 = int_to_ptr.hbm [resolvable:$true] %s345_s7 }
  0x2a   : > { %s888_s5 = sshll.u32 %s276_s15, 4  ;;  %s308_s8 = scalar_lea.sflag [#allocation4], %s862_s22  ;;  %s344_s5 = int_to_ptr.vmem [resolvable:$true] %s888_s5 }
  0x2b   : > { %s659_s28 = sshra.s32 %s330_s4, 4  ;;  %s665_s9 = scalar_lea.hbm %s944_s2, 16  ;;  %s660_s28 = int_to_ptr.hbm [resolvable:$true] %s659_s28 }
  0x2c   : > { %s661_s29 = scalar_lea.hbm %s660_s28, 8  ;;  %p666_p7 = scmp.lt.s32.totalorder %s660_s28, %s944_s2 }
  0x2d   : > { %p662_p4 = scmp.ne.s32.totalorder %s660_s28, %s661_s29  ;;  %p667_p8 = scmp.lt.s32.totalorder %s665_s9, %s661_s29 }
  0x2f   : > { %v584_v3 = vpop.eup %583  ;;  %p663_p5 = pnand %p662_p4, %p836_p9  ;;  %p668_p10 = por %p667_p8, %p666_p7 }
  0x30   : > { %v293_v4 = vmul.f32 0.5, %v584_v3 }
  0x31   : > { %p664_p6 = pneg %p663_p5 }
  0x32   : > { %v294_v6 = vadd.f32 0.5, %v293_v4 }
  0x33   : > { %p669_p13 = pnand %p668_p10, %p664_p6 }
  0x34   : > { %v297_v7 = vmul.f32 %v296_v5, %v294_v6  ;;  %v298_v8 = vadd.f32 %v296_v5, %v294_v6 }
  0x36   : > { %302 = vst [vmem:[%s269_s21] sm:$0xff] %v297_v7 }
  0x37   : > { %306 = vst [vmem:[%s276_s15] sm:$0xff] %v298_v8 }
  0x38   : > { %672 = shalt.err (!%p669_p13)
}
  0x39   : > { %514 = dma.vmem_to_hbm [thread:$0]  (%p836_p9), %s328_s23, 128, %s330_s4, %s308_s8  }
  0x3a   : > { %s313_s18 = scalar_lea.sflag [#allocation9], %s862_s22  ;;  %s687_s19 = sshra.s32 %s891_s7, 4  ;;  %s688_s19 = int_to_ptr.hbm [resolvable:$true] %s687_s19 }
  0x3b   : > { %s689_s24 = scalar_lea.hbm %s688_s19, 8  ;;  %s693_s28 = scalar_lea.hbm %s945_s3, 16 }
  0x3c   : > { %p690_p0 = scmp.ne.s32.totalorder %s688_s19, %s689_s24  ;;  %p694_p3 = scmp.lt.s32.totalorder %s688_s19, %s945_s3 }
  0x3d   : > { %p695_p4 = scmp.lt.s32.totalorder %s693_s28, %s689_s24 }
  0x3e   : > { %p691_p1 = pnand %p690_p0, %p836_p9 }
  0x3f   : > { %p696_p5 = por %p695_p4, %p694_p3 }
  0x40   : > { %p692_p2 = pneg %p691_p1 }
  0x42   : > { %p697_p6 = pnand %p696_p5, %p692_p2 }
  0x44   : > { %700 = shalt.err (!%p697_p6)
}
  0x45   : > { %515 = dma.vmem_to_hbm [thread:$0]  (%p836_p9), %s344_s5, 128, %s891_s7, %s313_s18  }
  0x46 PF: > { %s357_s22 = sand.u32 1, %s743_s12   ;;  %p526_p7 = pnand %p494_p12, %p843_p11 }
  0x47   : > { %s358_s23 = scalar_lea.sflag [#allocation4], %s357_s22 }
  0x48   : > { %p527_p8 = pneg %p526_p7 }
  0x4a   : > { %734 = dma.done.wait (%p527_p8), %s358_s23, 128  }
  0x4b   : > { %736 = vsyncadd (%p527_p8), %s358_s23, 4294967168  ;;  %s368_s4 = scalar_lea.sflag [#allocation9], %s357_s22 }
  0x4c   : > { %738 = dma.done.wait (%p527_p8), %s368_s4, 128  }
  0x4d   : > { %740 = vsyncadd (%p527_p8), %s368_s4, 4294967168  ;;  %s26_s17 = sadd.s32 1, %s763_s17   ;;  %s950_s12 = smov %s747_s13 }
  0x4e   : > { %p23_p10 = scmp.ge.s32.totalorder %s26_s17, 4   ;;  %s951_s13 = smov %s751_s14 }
  0x4f   : > { %s952_s14 = smov %s841_s26  ;;  %s953_s15 = smov %s759_s16 }
  0x50   : > { %s954_s16 = smov %s956_s20  ;;  %25 = sbr.rel (!%p23_p10) target bundleno = 10 (0xa), region = 107 }
  0x55   :  { %374 = vsyncpa [#allocation3], 1 }
  0x56   :  { %376 = vsyncpa [#allocation3 + $0x1], 1 }
  0x57   :  { %377 = vsyncpa [#allocation6], 1 }
  0x58   :  { %379 = vsyncpa [#allocation6 + $0x1], 1 }
  0x59   :  { %380 = vsyncpa [#allocation4], 1 }
  0x5a   :  { %382 = vsyncpa [#allocation4 + $0x1], 1 }
  0x5b   :  { %383 = vsyncpa [#allocation9], 1 }
  0x5c   :  { %385 = vsyncpa [#allocation9 + $0x1], 1 }

</bundles_post_ra>
